<compile_context>
chip_gen: v7x
topology: tpu7x:2x2x1
jax: 0.10.0
libtpu: 0.0.40
codegen_flags: <defaults>
</compile_context>

<pallas_src>
import functools

import jax
import jax.numpy as jnp
from jax.experimental import pallas as pl
from jax.experimental.pallas import tpu as pltpu


# Set True on TPU v7x (2 TensorCores/chip) to shard the batch grid axis across
# both cores.  Kept False by default so the kernel compiles unchanged on
# single-TC chips (v5e / v6e), where "parallel" is sufficient.
USE_CORE_PARALLEL = False

_VMEM_BUDGET_BYTES = 20 * 1024 * 1024   # tile-chooser budget (per TensorCore)
_VMEM_LIMIT_CAP = 48 * 1024 * 1024      # never request more scoped VMEM than this


def dqn_kernel(x_ref, w1_ref, b1_ref, w2_ref, b2_ref, o_ref, *, precision=None):
    """One batch tile of relu(x @ W1 + b1) @ W2 + b2, f32 accumulation."""
    mm_dtype = w1_ref.dtype
    # Cast the x tile to the matmul dtype inside the kernel (bf16 when enabled,
    # no-op for f32) -- no extra HBM pass over x in the wrapper.
    x = x_ref[...].astype(mm_dtype)
    h = jnp.dot(x, w1_ref[...], preferred_element_type=jnp.float32,
                precision=precision)
    h = jnp.maximum(h + b1_ref[...], 0.0)                 # bias + ReLU in f32
    out = jnp.dot(h.astype(mm_dtype), w2_ref[...],
                  preferred_element_type=jnp.float32, precision=precision)
    out = out + b2_ref[...]
    o_ref[...] = out.astype(o_ref.dtype)


def _cdiv(a, b):
    return (a + b - 1) // b


def _round_up(n, m):
    return _cdiv(n, m) * m


def _working_set_bytes(tile, in_size, hidden, out_size, x_item, mm_item, out_item):
    """Approximate per-TensorCore VMEM working set for one grid step."""
    # Weights / biases: constant index_map => DMA'd once, but the default
    # pipeliner still allocates two buffers.
    weights = 2 * ((in_size * hidden + hidden * out_size) * mm_item
                   + (hidden + out_size) * 4)
    # Double-buffered x / out tiles.
    tiles = 2 * tile * (in_size * x_item + out_size * out_item)
    # In-kernel temporaries: x cast, f32 hidden, hidden cast, f32 out.
    temps = tile * (in_size * mm_item + hidden * (4 + mm_item) + out_size * 4)
    return weights + tiles + temps


def _choose_batch_tile(B, in_size, hidden, out_size, x_item, mm_item, out_item,
                       max_tile, vmem_budget):
    tile = min(max_tile, _round_up(B, 8))
    # Keep the block no larger than the batch dim when possible (the ragged
    # last block is still masked by Pallas).
    if tile > B and B >= 8:
        tile = (B // 8) * 8
    # On large batches keep >= 4 grid steps (>= 2 per TC when core-parallel on
    # v7x) without dropping below 256 rows per step.
    if B >= 4 * 256:
        tile = min(tile, max(256, _round_up(_cdiv(B, 4), 8)))
    # Shrink until the working set fits the VMEM budget (safe on v5e/v6e/v7x).
    while tile > 8 and _working_set_bytes(
            tile, in_size, hidden, out_size, x_item, mm_item, out_item) > vmem_budget:
        tile = max(8, ((tile // 2) // 8) * 8)
    return tile


def deep_q_forward(x, w1, b1, w2, b2, *, batch_tile=None, use_bf16_matmul=True,
                   precision=None, max_batch_tile=1024,
                   vmem_budget_bytes=_VMEM_BUDGET_BYTES):
    """Fused forward pass: relu(x @ w1 + b1) @ w2 + b2.

    x : (B, input_size)             -- not copied, padded, or pre-cast.
    w1: (input_size, hidden_size)    b1: (hidden_size,) or (1, hidden_size)
    w2: (hidden_size, output_size)   b2: (output_size,) or (1, output_size)

    use_bf16_matmul: bf16 MXU operands with f32 accumulate/bias/ReLU (default).
    precision: forwarded to jnp.dot; use jax.lax.Precision.HIGHEST together
      with use_bf16_matmul=False for full f32 parity with PyTorch.
    """
    B, in_size = x.shape
    hidden = w1.shape[1]
    out_size = w2.shape[1]
    out_dtype = x.dtype

    mm_dtype = jnp.bfloat16 if use_bf16_matmul else x.dtype
    mm_item = jnp.dtype(mm_dtype).itemsize
    x_item = jnp.dtype(x.dtype).itemsize
    out_item = jnp.dtype(out_dtype).itemsize

    # Weights / biases are tiny: cast once in the wrapper (no-op if already so).
    w1c = w1.astype(mm_dtype)
    w2c = w2.astype(mm_dtype)
    b1c = b1.reshape(1, hidden).astype(jnp.float32)
    b2c = b2.reshape(1, out_size).astype(jnp.float32)

    if batch_tile is None:
        batch_tile = _choose_batch_tile(B, in_size, hidden, out_size,
                                        x_item, mm_item, out_item,
                                        max_tile=max_batch_tile,
                                        vmem_budget=vmem_budget_bytes)
    assert batch_tile % 8 == 0, "batch_tile must be a multiple of 8 sublanes"

    num_tiles = _cdiv(B, batch_tile)   # ragged last tile is masked by Pallas

    ws = _working_set_bytes(batch_tile, in_size, hidden, out_size,
                            x_item, mm_item, out_item)
    vmem_limit = int(min(_VMEM_LIMIT_CAP,
                         max(ws + 8 * 1024 * 1024, 16 * 1024 * 1024)))

    batch_axis = pltpu.CORE_PARALLEL if USE_CORE_PARALLEL else "parallel"

    return pl.pallas_call(
        functools.partial(dqn_kernel, precision=precision),
        out_shape=jax.ShapeDtypeStruct((B, out_size), out_dtype),
        grid=(num_tiles,),
        in_specs=[
            # x tile: last dim equals the full feature dim (no 128 padding).
            pl.BlockSpec((batch_tile, in_size), lambda i: (i, 0)),
            # Weights / biases: full arrays, constant block index -> resident.
            pl.BlockSpec((in_size, hidden), lambda i: (0, 0)),
            pl.BlockSpec((1, hidden), lambda i: (0, 0)),
            pl.BlockSpec((hidden, out_size), lambda i: (0, 0)),
            pl.BlockSpec((1, out_size), lambda i: (0, 0)),
        ],
        # True-shape output: no lane padding, no external slice copy.
        out_specs=pl.BlockSpec((batch_tile, out_size), lambda i: (i, 0)),
        compiler_params=pltpu.CompilerParams(
            dimension_semantics=(batch_axis,),
            vmem_limit_bytes=vmem_limit,
        ),
    )(x, w1c, b1c, w2c, b2c)


def init_params(key, input_size, hidden_size, output_size):
    """Deterministic init mimicking nn.Linear's U(-1/sqrt(fan_in), 1/sqrt(fan_in))."""
    k1, k2, k3, k4 = jax.random.split(key, 4)
    lim1 = 1.0 / jnp.sqrt(input_size)
    lim2 = 1.0 / jnp.sqrt(hidden_size)
    w1 = jax.random.uniform(k1, (input_size, hidden_size), jnp.float32, -lim1, lim1)
    b1 = jax.random.uniform(k2, (1, hidden_size), jnp.float32, -lim1, lim1)
    w2 = jax.random.uniform(k3, (hidden_size, output_size), jnp.float32, -lim2, lim2)
    b2 = jax.random.uniform(k4, (1, output_size), jnp.float32, -lim2, lim2)
    return w1, b1, w2, b2


def reference_forward(x, w1, b1, w2, b2):
    """Pure-JAX reference at highest f32 precision."""
    h = jnp.maximum(
        jnp.dot(x, w1, precision=jax.lax.Precision.HIGHEST) + b1.reshape(1, -1), 0.0)
    return jnp.dot(h, w2, precision=jax.lax.Precision.HIGHEST) + b2.reshape(1, -1)


if __name__ == "__main__":
    key = jax.random.PRNGKey(0)
    kx1, kp1, kx2, kp2, kx3 = jax.random.split(key, 5)

    # --- Test 1: literal module-sized shapes, f32 path at highest precision ---
    B1, in1, hid1, out1 = 8, 16, 32, 4
    x1 = jax.random.normal(kx1, (B1, in1), jnp.float32)
    p1 = init_params(kp1, in1, hid1, out1)
    ref1 = reference_forward(x1, *p1)

    out1_f32 = jax.block_until_ready(
        deep_q_forward(x1, *p1, use_bf16_matmul=False,
                       precision=jax.lax.Precision.HIGHEST))
    assert out1_f32.shape == (B1, out1)
    assert jnp.allclose(out1_f32, ref1, atol=1e-5, rtol=1e-5)

    # Same shapes through the default bf16-operand path (looser tolerance).
    out1_bf16 = jax.block_until_ready(deep_q_forward(x1, *p1))
    assert jnp.allclose(out1_bf16, ref1, atol=3e-2, rtol=3e-2)

    # --- Test 2: replay-buffer sized batch -> multi-step grid (4 tiles x 256) ---
    B2, in2, hid2, out2 = 1024, 128, 256, 8
    x2 = jax.random.normal(kx2, (B2, in2), jnp.float32)
    p2 = init_params(kp2, in2, hid2, out2)
    ref2 = reference_forward(x2, *p2)

    out2_bf16 = jax.block_until_ready(deep_q_forward(x2, *p2))
    assert out2_bf16.shape == (B2, out2)
    assert jnp.allclose(out2_bf16, ref2, atol=5e-2, rtol=5e-2)

    out2_f32 = jax.block_until_ready(
        deep_q_forward(x2, *p2, use_bf16_matmul=False))
    assert jnp.allclose(out2_f32, ref2, atol=2e-2, rtol=2e-2)

    # --- Test 3: ragged batch (no wrapper padding; masked last block) ---
    B3 = 100
    x3 = jax.random.normal(kx3, (B3, in1), jnp.float32)
    ref3 = reference_forward(x3, *p1)
    out3 = jax.block_until_ready(
        deep_q_forward(x3, *p1, use_bf16_matmul=False,
                       precision=jax.lax.Precision.HIGHEST))
    assert out3.shape == (B3, out1)
    assert jnp.allclose(out3, ref3, atol=1e-5, rtol=1e-5)

    print("KERNEL_OK")
</pallas_src>

<mosaic_0001>
module attributes {stable_mosaic.version = 11 : i64} {
  func.func @dqn_kernel(%arg0: i32, %arg1: memref<8x16xf32, #tpu.memory_space<vmem>>, %arg2: memref<16x32xf32, #tpu.memory_space<vmem>>, %arg3: memref<1x32xf32, #tpu.memory_space<vmem>>, %arg4: memref<32x4xf32, #tpu.memory_space<vmem>>, %arg5: memref<1x4xf32, #tpu.memory_space<vmem>>, %arg6: memref<8x4xf32, #tpu.memory_space<vmem>>) attributes {dimension_semantics = [#tpu.dimension_semantics<parallel>], iteration_bounds = array<i64: 1>, scalar_prefetch = 0 : i64, scratch_operands = 0 : i64, tpu.core_type = #tpu.core_type<tc>, window_params = [{transform_indices = @transform_0, window_bounds = array<i64: 8, 16>}, {pipeline_mode = #tpu.pipeline_mode<synchronous>, transform_indices = @transform_1, window_bounds = array<i64: 16, 32>}, {pipeline_mode = #tpu.pipeline_mode<synchronous>, transform_indices = @transform_2, window_bounds = array<i64: 1, 32>}, {pipeline_mode = #tpu.pipeline_mode<synchronous>, transform_indices = @transform_3, window_bounds = array<i64: 32, 4>}, {pipeline_mode = #tpu.pipeline_mode<synchronous>, transform_indices = @transform_4, window_bounds = array<i64: 1, 4>}, {transform_indices = @transform_5, window_bounds = array<i64: 8, 4>}]} {
    %c0 = arith.constant 0 : index
    %c0_0 = arith.constant 0 : index
    %0 = vector.load %arg1[%c0, %c0_0] : memref<8x16xf32, #tpu.memory_space<vmem>>, vector<8x16xf32>
    %c0_1 = arith.constant 0 : index
    %c0_2 = arith.constant 0 : index
    %1 = vector.load %arg2[%c0_1, %c0_2] : memref<16x32xf32, #tpu.memory_space<vmem>>, vector<16x32xf32>
    %cst = arith.constant dense<0.000000e+00> : vector<8x32xf32>
    %2 = tpu.matmul %0, %1, %cst {dimension_numbers = #tpu.dot_dimension_numbers<[1], [0], [0], [1], [0, 0, 1, 1], [], []>, precision = #tpu.contract_precision<fp32>} : vector<8x16xf32>, vector<16x32xf32>, vector<8x32xf32> -> vector<8x32xf32>
    %c0_3 = arith.constant 0 : index
    %c0_4 = arith.constant 0 : index
    %3 = vector.load %arg3[%c0_3, %c0_4] : memref<1x32xf32, #tpu.memory_space<vmem>>, vector<1x32xf32>
    %4 = vector.broadcast %3 : vector<1x32xf32> to vector<8x32xf32>
    %5 = arith.addf %2, %4 : vector<8x32xf32>
    %cst_5 = arith.constant 0.000000e+00 : f32
    %6 = vector.broadcast %cst_5 : f32 to vector<8x32xf32>
    %7 = arith.maximumf %5, %6 : vector<8x32xf32>
    %c0_6 = arith.constant 0 : index
    %c0_7 = arith.constant 0 : index
    %8 = vector.load %arg4[%c0_6, %c0_7] : memref<32x4xf32, #tpu.memory_space<vmem>>, vector<32x4xf32>
    %cst_8 = arith.constant dense<0.000000e+00> : vector<8x4xf32>
    %9 = tpu.matmul %7, %8, %cst_8 {dimension_numbers = #tpu.dot_dimension_numbers<[1], [0], [0], [1], [0, 0, 1, 1], [], []>, precision = #tpu.contract_precision<fp32>} : vector<8x32xf32>, vector<32x4xf32>, vector<8x4xf32> -> vector<8x4xf32>
    %c0_9 = arith.constant 0 : index
    %c0_10 = arith.constant 0 : index
    %10 = vector.load %arg5[%c0_9, %c0_10] : memref<1x4xf32, #tpu.memory_space<vmem>>, vector<1x4xf32>
    %11 = vector.broadcast %10 : vector<1x4xf32> to vector<8x4xf32>
    %12 = arith.addf %9, %11 : vector<8x4xf32>
    %c0_11 = arith.constant 0 : index
    %c0_12 = arith.constant 0 : index
    %13 = vector.load %arg6[%c0_11, %c0_12] : memref<8x4xf32, #tpu.memory_space<vmem>>, vector<8x4xf32>
    tpu.vector_store %arg6[%c0_11, %c0_12], %12 {strides = array<i32>} : memref<8x4xf32, #tpu.memory_space<vmem>>, vector<8x4xf32>,
    return
  }
  func.func @transform_0(%arg0: i32) -> (i32, i32) {
    %c0_i32 = arith.constant 0 : i32
    %c0_i32_0 = arith.constant 0 : i32
    return %arg0, %c0_i32 : i32, i32
  }
  func.func @transform_1(%arg0: i32) -> (i32, i32) {
    %c0_i32 = arith.constant 0 : i32
    %c0_i32_0 = arith.constant 0 : i32
    %c0_i32_1 = arith.constant 0 : i32
    return %c0_i32, %c0_i32_0 : i32, i32
  }
  func.func @transform_2(%arg0: i32) -> (i32, i32) {
    %c0_i32 = arith.constant 0 : i32
    %c0_i32_0 = arith.constant 0 : i32
    %c0_i32_1 = arith.constant 0 : i32
    return %c0_i32, %c0_i32_0 : i32, i32
  }
  func.func @transform_3(%arg0: i32) -> (i32, i32) {
    %c0_i32 = arith.constant 0 : i32
    %c0_i32_0 = arith.constant 0 : i32
    %c0_i32_1 = arith.constant 0 : i32
    return %c0_i32, %c0_i32_0 : i32, i32
  }
  func.func @transform_4(%arg0: i32) -> (i32, i32) {
    %c0_i32 = arith.constant 0 : i32
    %c0_i32_0 = arith.constant 0 : i32
    %c0_i32_1 = arith.constant 0 : i32
    return %c0_i32, %c0_i32_0 : i32, i32
  }
  func.func @transform_5(%arg0: i32) -> (i32, i32) {
    %c0_i32 = arith.constant 0 : i32
    %c0_i32_0 = arith.constant 0 : i32
    return %arg0, %c0_i32 : i32, i32
  }
}

</mosaic_0001>

<bundles_post_ra>
// kernel: tpu_custom_call.1
= control target key start
LH: loop header
LB: loop body
LE: loop exit
PB: predicated region body
PF: predicated region fallthrough
CT: control target
= control target key end

     0   :  { %vm30_vm0 = vcmask 130048   ;;  %v1236_v0 = vmov 0.0|0.0   ;;  %vm1237_vm1 = vmmov 0   ;;  %v1238_v3 = vmov 0.0   ;;  %s1341_s1 = inlined_call_operand.vmem [shape: f32[16,32], index: 1, kind: input, shape index: {}]   ;;  %s1342_s0 = inlined_call_operand.vmem [shape: f32[8,16], index: 0, kind: input, shape index: {}]   ;;  %s1343_s3 = inlined_call_operand.vmem [shape: f32[32,4], index: 3, kind: input, shape index: {}]   ;;  %s1344_s2 = inlined_call_operand.vmem [shape: f32[1,32], index: 2, kind: input, shape index: {}]   ;;  %s1345_s4 = inlined_call_operand.vmem [shape: f32[1,4], index: 4, kind: input, shape index: {}]   ;;  %s1346_s5 = inlined_call_operand.vmem [shape: f32[8,4], index: 5, kind: output, shape index: {}]  }
   0x1   :  { %1158 = vmatprep.subr.bf16.mxu0 %v1236_v0  ;;  %v21_v1 = vld [vmem:[%s1341_s1] sm:$0xff]  ;;  %v22_v2 = vld [vmem:[%s1341_s1 + $0x8] sm:$0xff]  ;;  %1054 = vmatprep.mubr.msk.f32.mxu0 %vm1237_vm1, %v1238_v3  ;;  %v496_v31 = vld [vmem:[%s1343_s3 + $0x10] sm:$0xff]  ;;  %vm505_vm2 = vcmask 261120   ;;  %vm994_vm3 = vcmask 31744  }
   0x2   :  { %v20_v4 = vld [vmem:[%s1342_s0] sm:$0xff]  ;;  %v35_v5 = vand.u32 4294901760, %v21_v1  ;;  %v38_v6 = vand.u32 4294901760, %v22_v2  ;;  %1182 = vmatprep.subr.bf16.mxu1 %v1236_v0  ;;  %1111 = vmatprep.mubr.msk.f32.mxu1 %vm1237_vm1, %v1238_v3  ;;  %v495_v26 = vld [vmem:[%s1343_s3 + $0x8] sm:$0xff]  ;;  %v497_v32 = vld [vmem:[%s1343_s3 + $0x18] sm:$0xff]  ;;  %v516_v35 = vand.u32 4294901760, %v496_v31 }
   0x3   :  { %v32_v7 = vsel %vm30_vm0, %v20_v4, 0  ;;  %v494_v25 = vld [vmem:[%s1343_s3] sm:$0xff]  ;;  %v513_v28 = vand.u32 4294901760, %v495_v26  ;;  %v519_v36 = vand.u32 4294901760, %v497_v32 }
   0x4   :  { %v101_v8 = vand.u32 4294901760, %v32_v7  ;;  %v1159_v9 = vpack.c.bf16 %v38_v6, %v35_v5  ;;  %v113_v10 = vsub.f32 %v21_v1, %v35_v5  ;;  %v120_v11 = vsub.f32 %v22_v2, %v38_v6  ;;  %v1000_v57 = vld [vmem:[%s1344_s2] ss:$0 sm:$0xff] }
   0x5   :  { %v510_v27 = vand.u32 4294901760, %v494_v25  ;;  %v597_v30 = vsub.f32 %v495_v26, %v513_v28  ;;  %v604_v39 = vsub.f32 %v496_v31, %v516_v35  ;;  %v611_v40 = vsub.f32 %v497_v32, %v519_v36 }
   0x6   :  { %v102_v12 = vsub.f32 %v32_v7, %v101_v8  ;;  %1160 = vmatpush3.bf16.msra.mxu0 %v1159_v9  ;;  %v114_v13 = vand.u32 4294901760, %v113_v10  ;;  %v121_v14 = vand.u32 4294901760, %v120_v11  ;;  %v1165_v23 = vpack.c.bf16 %v120_v11, %v113_v10 }
   0x7   :  { %1161 = vmatprep.subr.bf16.mxu0 %v1236_v0  ;;  %v590_v29 = vsub.f32 %v494_v25, %v510_v27  ;;  %v598_v34 = vand.u32 4294901760, %v597_v30  ;;  %v605_v43 = vand.u32 4294901760, %v604_v39  ;;  %v612_v44 = vand.u32 4294901760, %v611_v40 }
   0x8   :  { %v103_v15 = vand.u32 4294901760, %v102_v12  ;;  %v115_v16 = vsub.f32 %v113_v10, %v114_v13  ;;  %v122_v17 = vsub.f32 %v120_v11, %v121_v14  ;;  %v1171_v24 = vpack.c.bf16 %v121_v14, %v114_v13 }
   0x9   :  { %v591_v33 = vand.u32 4294901760, %v590_v29  ;;  %v599_v38 = vsub.f32 %v597_v30, %v598_v34  ;;  %v606_v46 = vsub.f32 %v604_v39, %v605_v43  ;;  %v613_v47 = vsub.f32 %v611_v40, %v612_v44 }
   0xa   :  { %v104_v18 = vsub.f32 %v102_v12, %v103_v15  ;;  %v116_v19 = vand.u32 4294901760, %v115_v16  ;;  %v123_v20 = vand.u32 4294901760, %v122_v17  ;;  %v1177_v51 = vpack.c.bf16 %v513_v28, %v510_v27 }
   0xb   :  { %v592_v37 = vsub.f32 %v590_v29, %v591_v33  ;;  %v600_v42 = vand.u32 4294901760, %v599_v38  ;;  %v607_v48 = vand.u32 4294901760, %v606_v46  ;;  %v614_v49 = vand.u32 4294901760, %v613_v47 }
   0xc   :  { %v105_v21 = vand.u32 4294901760, %v104_v18  ;;  %v1162_v22 = vpack.c.bf16 %v123_v20, %v116_v19  ;;  %v1189_v52 = vpack.c.bf16 %v597_v30, %v590_v29  ;;  %v1180_v53 = vpack.c.bf16 %v519_v36, %v516_v35 }
   0xd   :  { %v593_v41 = vand.u32 4294901760, %v592_v37  ;;  %v1186_v50 = vpack.c.bf16 %v614_v49, %v607_v48  ;;  %v1192_v54 = vpack.c.bf16 %v611_v40, %v604_v39  ;;  %v1201_v55 = vpack.c.bf16 %v598_v34, %v591_v33 }
   0xe   :  { %1055 = vmatmul.mubr.f32.vlgmr.msra.gmra.mrb[0].mxu0 %v105_v21  ;;  %v1204_v56 = vpack.c.bf16 %v612_v44, %v605_v43 }
   0xf   :  { %1163 = vmatpush3.bf16.msra.mxu0 %v1162_v22  ;;  %1061 = vmatprep.mubr.msk.f32.mxu0 %vm1237_vm1, %v1238_v3  ;;  %v1183_v45 = vpack.c.bf16 %v600_v42, %v593_v41 }
  0x10   :  { %1164 = vmatprep.subr.bf16.mxu0 %v1236_v0 }
  0x11   :  { %1184 = vmatpush3.bf16.msra.mxu1 %v1183_v45 }
  0x12   :  { %1185 = vmatprep.subr.bf16.mxu1 %v1236_v0 }
  0x15   :  { %1187 = vmatpush3.bf16.msra.mxu1 %v1186_v50 }
  0x16   :  { %1062 = vmatmul.mubr.f32.vlgmr.msra.gmra.mrb[0].mxu0 %v101_v8  ;;  %1188 = vmatprep.subr.bf16.mxu1 %v1236_v0 }
  0x17   :  { %1166 = vmatpush3.bf16.msra.mxu0 %v1165_v23  ;;  %1068 = vmatprep.mubr.msk.f32.mxu0 %vm1237_vm1, %v1238_v3 }
  0x18   :  { %1167 = vmatprep.subr.bf16.mxu0 %v1236_v0 }
  0x1e   :  { %1069 = vmatmul.mubr.f32.vlgmr.msra.gmra.mrb[0].mxu0 %v102_v12 }
  0x1f   :  { %1169 = vmatpush3.bf16.msra.mxu0 %v1159_v9  ;;  %1075 = vmatprep.mubr.msk.f32.mxu0 %vm1237_vm1, %v1238_v3 }
  0x20   :  { %1170 = vmatprep.subr.bf16.mxu0 %v1236_v0 }
  0x26   :  { %1076 = vmatmul.mubr.f32.vlgmr.msra.gmra.mrb[0].mxu0 %v103_v15 }
  0x27   :  { %1172 = vmatpush3.bf16.msra.mxu0 %v1171_v24  ;;  %1082 = vmatprep.mubr.msk.f32.mxu0 %vm1237_vm1, %v1238_v3 }
  0x28   :  { %1173 = vmatprep.subr.bf16.mxu0 %v1236_v0 }
  0x2e   :  { %1083 = vmatmul.mubr.f32.vlgmr.msra.gmra.mrb[0].mxu0 %v101_v8 }
  0x2f   :  { %1175 = vmatpush3.bf16.msra.mxu0 %v1159_v9  ;;  %1089 = vmatprep.mubr.msk.f32.mxu0 %vm1237_vm1, %v1238_v3 }
  0x30   :  { %1176 = vmatprep.subr.bf16.mxu0 %v1236_v0 }
  0x36   :  { %1090 = vmatmul.mubr.f32.vlgmr.msra.gmra.mrb[0].mxu0 %v101_v8  ;;  %v1001_v8 = vld [vmem:[%s1345_s4] ss:$0 sm:$0xff] }
  0x37   :  { %1100 = vmatprep.mubr.msk.f32.mxu0 %vm1237_vm1, %v1238_v3  ;;  %1178 = vmatpush3.bf16.msra.mxu0 %v1177_v51 }
  0x38   :  { %1179 = vmatprep.subr.bf16.mxu0 %v1236_v0 }
  0x3b   :  { %1181 = vmatpush3.bf16.msra.mxu0 %v1180_v53 }
 0x109   :  { %v489_v58 = vpop.f32.mrb[0].mxu0 }
 0x10a   :  { %v1212_v59 = vadd.f32 %v1000_v57, %v489_v58  ;;  %v1091_v60 = vpop.f32.mrb[1].mxu0 }
 0x10c   :  { %v493_v61 = vmax.f32 %v1212_v59, 0.0 }
 0x10e   :  { %v507_v62 = vsel %vm505_vm2, %v493_v61, 0 }
 0x10f   :  { %v578_v63 = vand.u32 4294901760, %v507_v62 }
 0x111   :  { %v579_v1 = vsub.f32 %v507_v62, %v578_v63  ;;  %1112 = vmatmul.mubr.f32.vlgmr.msra.gmra.mrb[0].mxu1 %v578_v63 }
 0x112   :  { %1190 = vmatpush3.bf16.msra.mxu1 %v1189_v52  ;;  %1122 = vmatprep.mubr.msk.f32.mxu1 %vm1237_vm1, %v1238_v3 }
 0x113   :  { %v580_v2 = vand.u32 4294901760, %v579_v1  ;;  %1191 = vmatprep.subr.bf16.mxu1 %v1236_v0 }
 0x115   :  { %v581_v4 = vsub.f32 %v579_v1, %v580_v2 }
 0x116   :  { %1193 = vmatpush3.bf16.msra.mxu1 %v1192_v54 }
 0x117   :  { %v582_v5 = vand.u32 4294901760, %v581_v4  ;;  %1194 = vmatprep.subr.bf16.mxu1 %v1236_v0 }
 0x119   :  { %1101 = vmatmul.mubr.f32.vlgmr.msra.gmra.mrb[2].mxu0 %v582_v5  ;;  %1123 = vmatmul.mubr.f32.vlgmr.msra.gmra.mrb[0].mxu1 %v579_v1 }
 0x11a   :  { %1196 = vmatpush3.bf16.msra.mxu1 %v1177_v51  ;;  %1133 = vmatprep.mubr.msk.f32.mxu1 %vm1237_vm1, %v1238_v3 }
 0x11b   :  { %1197 = vmatprep.subr.bf16.mxu1 %v1236_v0 }
 0x11e   :  { %1199 = vmatpush3.bf16.msra.mxu1 %v1180_v53 }
 0x11f   :  { %1200 = vmatprep.subr.bf16.mxu1 %v1236_v0 }
 0x121   :  { %1134 = vmatmul.mubr.f32.vlgmr.msra.gmra.mrb[0].mxu1 %v580_v2 }
 0x122   :  { %1202 = vmatpush3.bf16.msra.mxu1 %v1201_v55  ;;  %1144 = vmatprep.mubr.msk.f32.mxu1 %vm1237_vm1, %v1238_v3 }
 0x123   :  { %1203 = vmatprep.subr.bf16.mxu1 %v1236_v0 }
 0x126   :  { %1205 = vmatpush3.bf16.msra.mxu1 %v1204_v56 }
 0x127   :  { %1206 = vmatprep.subr.bf16.mxu1 %v1236_v0 }
 0x129   :  { %1145 = vmatmul.mubr.f32.vlgmr.msra.gmra.mrb[0].mxu1 %v578_v63 }
 0x12a   :  { %1208 = vmatpush3.bf16.msra.mxu1 %v1177_v51  ;;  %1155 = vmatprep.mubr.msk.f32.mxu1 %vm1237_vm1, %v1238_v3 }
 0x12b   :  { %1209 = vmatprep.subr.bf16.mxu1 %v1236_v0 }
 0x12e   :  { %1211 = vmatpush3.bf16.msra.mxu1 %v1180_v53 }
 0x131   :  { %1156 = vmatmul.mubr.f32.vlgmr.msra.gmra.mrb[0].mxu1 %v578_v63 }
 0x1ec   :  { %v584_v6 = vpop.f32.mrb[2].mxu0 }
 0x1ed   :  { %v1102_v7 = vpop.f32.mrb[3].mxu0  ;;  %v585_v9 = vadd.f32 %v1001_v8, %v584_v6 }
 0x204   :  { %v990_v10 = vpop.f32.mrb[0].mxu1 }
 0x205   :  { %v1214_v11 = vadd.f32 %v990_v10, %v585_v9  ;;  %v1157_v12 = vpop.f32.mrb[1].mxu1 }
 0x207   :  { %995 = vst.msk [vmem:[%s1346_s5] sm:$0xff] %vm994_vm3, %v1214_v11 }

</bundles_post_ra>
